<compile_context>
chip_gen: v7x
topology: tpu7x:2x2x1
jax: 0.10.0
libtpu: 0.0.40
codegen_flags: <defaults>
</compile_context>

<pallas_src>
import jax
import jax.numpy as jnp
from jax.experimental import pallas as pl
from jax.experimental.pallas import tpu as pltpu

HIDDEN = 128


def _round_up(n, m):
    return ((n + m - 1) // m) * m


def _discriminator_kernel(x_ref, w1_ref, b1_ref, w2_ref, b2_ref, out_ref):
    """One batch tile of the forward pass.

    x_ref:   [tile_b, in_dim]  f32  (theta ++ x, concatenated in the wrapper)
    w1_ref:  [in_dim, 128]     f32  (resident: constant block index)
    b1_ref:  [1, 128]          f32
    w2_ref:  [1, 128]          f32  (second Linear weight stored as a row)
    b2_ref:  [1, 1]            f32  (SMEM scalar)
    out_ref: [1, 1, tile_b]    f32  (lane-dense probabilities for this tile)
    """
    # Linear(in_dim, 128) + bias + ReLU  -> [tile_b, 128]
    h = jnp.dot(x_ref[...], w1_ref[...], preferred_element_type=jnp.float32)
    h = jnp.maximum(h + b1_ref[...], 0.0)

    # Linear(128, 1) done as [1,128] @ [128,tile_b] so the result is a
    # lane-dense row (avoids a [tile_b,1] masked-store output layout).
    logits = jnp.dot(w2_ref[...], h.T, preferred_element_type=jnp.float32)  # [1, tile_b]
    probs = jax.nn.sigmoid(logits + b2_ref[0, 0])
    out_ref[...] = probs[None].astype(out_ref.dtype)


def discriminator_forward(theta, x, w1, b1, w2_row, b2, *, max_tile_b=1024):
    """theta: [B, theta_dim], x: [B, x_dim] -> [B, 1] probabilities."""
    B = theta.shape[0]
    in_dim = theta.shape[1] + x.shape[1]

    # Concatenate on the XLA side -> one input array, no in-kernel lane concat.
    xin = jnp.concatenate([theta.astype(jnp.float32), x.astype(jnp.float32)], axis=1)

    # Batch tile: multiple of 128 (lane-dense output row), capped at max_tile_b.
    tile_b = min(max_tile_b, _round_up(B, 128))
    num_tiles = -(-B // tile_b)
    b_pad = num_tiles * tile_b
    if b_pad != B:
        xin = jnp.pad(xin, ((0, b_pad - B), (0, 0)))

    out = pl.pallas_call(
        _discriminator_kernel,
        out_shape=jax.ShapeDtypeStruct((num_tiles, 1, tile_b), jnp.float32),
        grid=(num_tiles,),
        in_specs=[
            pl.BlockSpec((tile_b, in_dim), lambda i: (i, 0)),       # batch tile (pipelined)
            pl.BlockSpec((in_dim, HIDDEN), lambda i: (0, 0)),       # w1, VMEM-resident
            pl.BlockSpec((1, HIDDEN), lambda i: (0, 0)),            # b1, VMEM-resident
            pl.BlockSpec((1, HIDDEN), lambda i: (0, 0)),            # w2 row, VMEM-resident
            pl.BlockSpec(memory_space=pltpu.MemorySpace.SMEM),      # b2 scalar
        ],
        out_specs=pl.BlockSpec((1, 1, tile_b), lambda i: (i, 0, 0)),
        compiler_params=pltpu.CompilerParams(
            dimension_semantics=("parallel",),
        ),
    )(xin, w1, b1, w2_row, b2)

    # (num_tiles, 1, tile_b) row-major flatten == padded batch order.
    return out.reshape(-1)[:B].reshape(B, 1)


def init_params(key, theta_dim, x_dim, hidden=HIDDEN):
    """PyTorch-default-style init (uniform +-1/sqrt(fan_in)).

    w1 is stored as [in, hidden]; w2 as a row [1, hidden]; b2 as [1, 1]."""
    in_dim = theta_dim + x_dim
    k1, k2, k3, k4 = jax.random.split(key, 4)
    bound1 = 1.0 / jnp.sqrt(in_dim)
    bound2 = 1.0 / jnp.sqrt(hidden)
    w1 = jax.random.uniform(k1, (in_dim, hidden), jnp.float32, -bound1, bound1)
    b1 = jax.random.uniform(k2, (1, hidden), jnp.float32, -bound1, bound1)
    w2_row = jax.random.uniform(k3, (1, hidden), jnp.float32, -bound2, bound2)
    b2 = jax.random.uniform(k4, (1, 1), jnp.float32, -bound2, bound2)
    return w1, b1, w2_row, b2


def reference_forward(theta, x, w1, b1, w2_row, b2):
    """Pure-JAX reference for correctness checking."""
    cat = jnp.concatenate([theta, x], axis=1)
    h = jnp.maximum(cat @ w1 + b1, 0.0)
    return jax.nn.sigmoid(h @ w2_row.T + b2)


if __name__ == "__main__":
    theta_dim, x_dim = 4, 12

    key = jax.random.PRNGKey(0)
    k_theta, k_x, k_params, k_theta2, k_x2 = jax.random.split(key, 5)
    w1, b1, w2_row, b2 = init_params(k_params, theta_dim, x_dim)

    # Small-shape check (single grid step, padded tail).
    batch = 8
    theta = jax.random.normal(k_theta, (batch, theta_dim), jnp.float32)
    x = jax.random.normal(k_x, (batch, x_dim), jnp.float32)
    out = jax.block_until_ready(discriminator_forward(theta, x, w1, b1, w2_row, b2))
    ref = reference_forward(theta, x, w1, b1, w2_row, b2)
    assert out.shape == (batch, 1)
    assert jnp.allclose(out, ref, atol=2e-5, rtol=2e-5), "mismatch vs reference (small)"

    # Multi-tile + ragged-batch check (exercises the grid and tail padding).
    batch2 = 3000
    theta2 = jax.random.normal(k_theta2, (batch2, theta_dim), jnp.float32)
    x2 = jax.random.normal(k_x2, (batch2, x_dim), jnp.float32)
    out2 = jax.block_until_ready(discriminator_forward(theta2, x2, w1, b1, w2_row, b2))
    ref2 = reference_forward(theta2, x2, w1, b1, w2_row, b2)
    assert out2.shape == (batch2, 1)
    assert jnp.allclose(out2, ref2, atol=2e-5, rtol=2e-5), "mismatch vs reference (tiled)"

    print("KERNEL_OK")
</pallas_src>

<mosaic_0001>
module attributes {stable_mosaic.version = 11 : i64} {
  func.func @_discriminator_kernel(%arg0: i32, %arg1: memref<128x16xf32, #tpu.memory_space<vmem>>, %arg2: memref<16x128xf32, #tpu.memory_space<vmem>>, %arg3: memref<1x128xf32, #tpu.memory_space<vmem>>, %arg4: memref<1x128xf32, #tpu.memory_space<vmem>>, %arg5: memref<1x1xf32, #tpu.memory_space<smem>>, %arg6: memref<1x1x128xf32, #tpu.memory_space<vmem>>) attributes {dimension_semantics = [#tpu.dimension_semantics<parallel>], iteration_bounds = array<i64: 1>, scalar_prefetch = 0 : i64, scratch_operands = 0 : i64, tpu.core_type = #tpu.core_type<tc>, window_params = [{transform_indices = @transform_0, window_bounds = array<i64: 128, 16>}, {pipeline_mode = #tpu.pipeline_mode<synchronous>, transform_indices = @transform_1, window_bounds = array<i64: 16, 128>}, {pipeline_mode = #tpu.pipeline_mode<synchronous>, transform_indices = @transform_2, window_bounds = array<i64: 1, 128>}, {pipeline_mode = #tpu.pipeline_mode<synchronous>, transform_indices = @transform_3, window_bounds = array<i64: 1, 128>}, {transform_indices = @transform_4, window_bounds = array<i64: 1, 1>}, {transform_indices = @transform_5, window_bounds = array<i64: 1, 1, 128>}]} {
    %c0 = arith.constant 0 : index
    %c0_0 = arith.constant 0 : index
    %0 = vector.load %arg1[%c0, %c0_0] : memref<128x16xf32, #tpu.memory_space<vmem>>, vector<128x16xf32>
    %c0_1 = arith.constant 0 : index
    %c0_2 = arith.constant 0 : index
    %1 = vector.load %arg2[%c0_1, %c0_2] : memref<16x128xf32, #tpu.memory_space<vmem>>, vector<16x128xf32>
    %cst = arith.constant dense<0.000000e+00> : vector<128x128xf32>
    %2 = tpu.matmul %0, %1, %cst {dimension_numbers = #tpu.dot_dimension_numbers<[1], [0], [0], [1], [0, 0, 1, 1], [], []>} : vector<128x16xf32>, vector<16x128xf32>, vector<128x128xf32> -> vector<128x128xf32>
    %c0_3 = arith.constant 0 : index
    %c0_4 = arith.constant 0 : index
    %3 = vector.load %arg3[%c0_3, %c0_4] : memref<1x128xf32, #tpu.memory_space<vmem>>, vector<1x128xf32>
    %4 = vector.broadcast %3 : vector<1x128xf32> to vector<128x128xf32>
    %5 = arith.addf %2, %4 : vector<128x128xf32>
    %cst_5 = arith.constant 0.000000e+00 : f32
    %6 = vector.broadcast %cst_5 : f32 to vector<128x128xf32>
    %7 = arith.maximumf %5, %6 : vector<128x128xf32>
    %c0_6 = arith.constant 0 : index
    %c0_7 = arith.constant 0 : index
    %8 = vector.load %arg4[%c0_6, %c0_7] : memref<1x128xf32, #tpu.memory_space<vmem>>, vector<1x128xf32>
    %9 = tpu.transpose %7, [1, 0] : vector<128x128xf32> -> vector<128x128xf32>
    %cst_8 = arith.constant dense<0.000000e+00> : vector<1x128xf32>
    %10 = tpu.matmul %8, %9, %cst_8 {dimension_numbers = #tpu.dot_dimension_numbers<[1], [0], [0], [1], [0, 0, 1, 1], [], []>} : vector<1x128xf32>, vector<128x128xf32>, vector<1x128xf32> -> vector<1x128xf32>
    %c0_9 = arith.constant 0 : index
    %c0_10 = arith.constant 0 : index
    %11 = memref.load %arg5[%c0_9, %c0_10] : memref<1x1xf32, #tpu.memory_space<smem>>
    %12 = vector.broadcast %11 : f32 to vector<1x128xf32>
    %13 = arith.addf %10, %12 : vector<1x128xf32>
    %14 = arith.negf %13 : vector<1x128xf32>
    %15 = math.exp %14 : vector<1x128xf32>
    %cst_11 = arith.constant 1.000000e+00 : f32
    %16 = vector.broadcast %cst_11 : f32 to vector<1x128xf32>
    %17 = arith.addf %16, %15 : vector<1x128xf32>
    %18 = arith.divf %16, %17 : vector<1x128xf32>
    %19 = vector.shape_cast %18 : vector<1x128xf32> to vector<1x1x128xf32>
    %c0_12 = arith.constant 0 : index
    %c0_13 = arith.constant 0 : index
    %c0_14 = arith.constant 0 : index
    %20 = vector.load %arg6[%c0_12, %c0_13, %c0_14] : memref<1x1x128xf32, #tpu.memory_space<vmem>>, vector<1x1x128xf32>
    tpu.vector_store %arg6[%c0_12, %c0_13, %c0_14], %19 {strides = array<i32>} : memref<1x1x128xf32, #tpu.memory_space<vmem>>, vector<1x1x128xf32>,
    return
  }
  func.func @transform_0(%arg0: i32) -> (i32, i32) {
    %c0_i32 = arith.constant 0 : i32
    %c0_i32_0 = arith.constant 0 : i32
    return %arg0, %c0_i32 : i32, i32
  }
  func.func @transform_1(%arg0: i32) -> (i32, i32) {
    %c0_i32 = arith.constant 0 : i32
    %c0_i32_0 = arith.constant 0 : i32
    %c0_i32_1 = arith.constant 0 : i32
    return %c0_i32, %c0_i32_0 : i32, i32
  }
  func.func @transform_2(%arg0: i32) -> (i32, i32) {
    %c0_i32 = arith.constant 0 : i32
    %c0_i32_0 = arith.constant 0 : i32
    %c0_i32_1 = arith.constant 0 : i32
    return %c0_i32, %c0_i32_0 : i32, i32
  }
  func.func @transform_3(%arg0: i32) -> (i32, i32) {
    %c0_i32 = arith.constant 0 : i32
    %c0_i32_0 = arith.constant 0 : i32
    %c0_i32_1 = arith.constant 0 : i32
    return %c0_i32, %c0_i32_0 : i32, i32
  }
  func.func @transform_4(%arg0: i32) -> (i32, i32) {
    %c0_i32 = arith.constant 0 : i32
    %c0_i32_0 = arith.constant 0 : i32
    %c0_i32_1 = arith.constant 0 : i32
    return %c0_i32, %c0_i32_0 : i32, i32
  }
  func.func @transform_5(%arg0: i32) -> (i32, i32, i32) {
    %c0_i32 = arith.constant 0 : i32
    %c0_i32_0 = arith.constant 0 : i32
    %c0_i32_1 = arith.constant 0 : i32
    return %arg0, %c0_i32, %c0_i32_0 : i32, i32, i32
  }
}

</mosaic_0001>

<bundles_post_ra>
// kernel: tpu_custom_call.1
= control target key start
LH: loop header
LB: loop body
LE: loop exit
PB: predicated region body
PF: predicated region fallthrough
CT: control target
= control target key end

     0   :  { %vm47_vm0 = vcmask 130048   ;;  %s660_s0 = inlined_call_operand.vmem [shape: f32[128,16], index: 0, kind: input, shape index: {}]   ;;  %s661_s1 = inlined_call_operand.vmem [shape: f32[16,128], index: 1, kind: input, shape index: {}]   ;;  %s662_s2 = inlined_call_operand.vmem [shape: f32[1,128], index: 2, kind: input, shape index: {}]   ;;  %s663_s3 = inlined_call_operand.vmem [shape: f32[1,128], index: 3, kind: input, shape index: {}]   ;;  %s664_s4 = inlined_call_operand.<no memory space> [shape: f32[1,1], index: 4, kind: input, shape index: {}]   ;;  %s665_s5 = inlined_call_operand.hbm [shape: f32[1,1,128], index: 5, kind: output, shape index: {}]  }
   0x1   :  { %v38_v0 = vld [vmem:[%s661_s1] sm:$0xff]  ;;  %v39_v1 = vld [vmem:[%s661_s1 + $0x8] sm:$0xff]  ;;  %v24_v5 = vld [vmem:[%s660_s0 + $0x10] sm:$0xff] }
   0x2   :  { %v22_v2 = vld [vmem:[%s660_s0] sm:$0xff]  ;;  %v467_v3 = vpack.c.bf16 %v39_v1, %v38_v0  ;;  %v23_v4 = vld [vmem:[%s660_s0 + $0x8] sm:$0xff] }
   0x3   :  { %408 = vmatprep.mubr.msk.f32.mxu0 %vm47_vm0, %v22_v2 }
   0x4   :  { %468 = vmatprep.subr.bf16.mxu0 %v467_v3 }
   0x5   :  { %470 = vmatpush3.bf16.msra.mxu0 %v467_v3 }
   0x6   :  { %11 = vsyncpa [#allocation4], 0  ;;  %v25_v6 = vld [vmem:[%s660_s0 + $0x18] sm:$0xff]  ;;  %v26_v7 = vld [vmem:[%s660_s0 + $0x20] sm:$0xff]  ;;  %v527_v19 = vmov 0.0|0.0   ;;  %vm528_vm1 = vmmov 0  }
   0x7   :  { %v27_v8 = vld [vmem:[%s660_s0 + $0x28] sm:$0xff]  ;;  %v28_v9 = vld [vmem:[%s660_s0 + $0x30] sm:$0xff]  ;;  %v29_v10 = vld [vmem:[%s660_s0 + $0x38] sm:$0xff]  ;;  %471 = vmatprep.subr.bf16.mxu1 %v527_v19  ;;  %v529_v20 = vmov 0.0   ;;  %s530_s6 = smov [#allocation3]  }
   0x8   :  { %409 = vmatmul.mubr.msk.f32.vlgmr.msra.gmra.mrb[0].mxu0 %vm47_vm0, %v23_v4  ;;  %v30_v11 = vld [vmem:[%s660_s0 + $0x40] sm:$0xff]  ;;  %v31_v12 = vld [vmem:[%s660_s0 + $0x48] sm:$0xff]  ;;  %v32_v13 = vld [vmem:[%s660_s0 + $0x50] sm:$0xff]  ;;  %464 = vmatprep.mubr.msk.f32.mxu1 %vm528_vm1, %v529_v20  ;;  %s343_s7 = sshll.u32 %s530_s6, 4  ;;  %s344_s7 = int_to_ptr.vmem [resolvable:$true] %s343_s7 }
   0x9   :  { %411 = vmatprep.mubr.msk.f32.mxu0 %vm47_vm0, %v24_v5  ;;  %v33_v14 = vld [vmem:[%s660_s0 + $0x58] sm:$0xff]  ;;  %v34_v15 = vld [vmem:[%s660_s0 + $0x60] sm:$0xff]  ;;  %v35_v16 = vld [vmem:[%s660_s0 + $0x68] sm:$0xff]  ;;  %s503_s8 = scalar_lea.vmem %s344_s7, 16  ;;  %p508_p1 = scmp.lt.s32.totalorder %s344_s7, %s344_s7 }
   0xa   :  { %v36_v17 = vld [vmem:[%s660_s0 + $0x70] sm:$0xff]  ;;  %v37_v18 = vld [vmem:[%s660_s0 + $0x78] sm:$0xff]  ;;  %v351_v21 = vld [vmem:[%s662_s2] ss:$0 sm:$0xff]  ;;  %p504_p0 = scmp.ne.s32.totalorder %s344_s7, %s503_s8 }
   0xc   :  { %412 = vmatmul.mubr.msk.f32.gmra.mrb[2].mxu0 %vm47_vm0, %v25_v6 }
   0xd   :  { %414 = vmatprep.mubr.msk.f32.mxu0 %vm47_vm0, %v26_v7 }
  0x10   :  { %415 = vmatmul.mubr.msk.f32.gmra.mrb[4].mxu0 %vm47_vm0, %v27_v8 }
  0x11   :  { %417 = vmatprep.mubr.msk.f32.mxu0 %vm47_vm0, %v28_v9 }
  0x14   :  { %418 = vmatmul.mubr.msk.f32.gmra.mrb[6].mxu0 %vm47_vm0, %v29_v10 }
  0x15   :  { %420 = vmatprep.mubr.msk.f32.mxu0 %vm47_vm0, %v30_v11 }
  0x18   :  { %421 = vmatmul.mubr.msk.f32.gmra.mrb[8].mxu0 %vm47_vm0, %v31_v12 }
  0x19   :  { %423 = vmatprep.mubr.msk.f32.mxu0 %vm47_vm0, %v32_v13 }
  0x1c   :  { %424 = vmatmul.mubr.msk.f32.gmra.mrb[10].mxu0 %vm47_vm0, %v33_v14  ;;  %v257_v14 = vld [vmem:[%s663_s3] sm:$0x1]  ;;  %s507_s3 = scalar_lea.vmem %s344_s7, 32 }
  0x1d   :  { %426 = vmatprep.mubr.msk.f32.mxu0 %vm47_vm0, %v34_v15  ;;  %v259_v15 = vstv %s664_s4  ;;  %p509_p2 = scmp.lt.s32.totalorder %s507_s3, %s503_s8 }
  0x1f   :  { %p510_p3 = por %p509_p2, %p508_p1 }
  0x20   :  { %427 = vmatmul.mubr.msk.f32.gmra.mrb[12].mxu0 %vm47_vm0, %v35_v16 }
  0x21   :  { %429 = vmatprep.mubr.msk.f32.mxu0 %vm47_vm0, %v36_v17  ;;  %p511_p4 = pnand %p510_p3, %p504_p0 }
  0x24   :  { %430 = vmatmul.mubr.msk.f32.gmra.mrb[14].mxu0 %vm47_vm0, %v37_v18 }
  0xdb   :  { %v410_v22 = vpop.f32.mrb[0].mxu0 }
  0xdc   :  { %v168_v23 = vadd.f32 %v410_v22, %v351_v21  ;;  %v162_v24 = vpop.f32.mrb[1].mxu0 }
  0xdd   :  { %v163_v25 = vadd.f32 %v351_v21, %v162_v24 }
  0xde   :  { %v242_v26 = vmax.f32 %v168_v23, 0.0 }
  0xdf   :  { %v241_v27 = vmax.f32 %v163_v25, 0.0  ;;  %v413_v28 = vpop.f32.mrb[2].mxu0 }
  0xe0   :  { %v178_v29 = vadd.f32 %v413_v28, %v351_v21  ;;  %v172_v30 = vpop.f32.mrb[3].mxu0 }
  0xe1   :  { %v173_v31 = vadd.f32 %v351_v21, %v172_v30  ;;  %v472_v32 = vpack.c.bf16 %v242_v26, %v241_v27 }
  0xe2   :  { %v244_v33 = vmax.f32 %v178_v29, 0.0 }
  0xe3   :  { %v243_v34 = vmax.f32 %v173_v31, 0.0  ;;  %473 = vmatpush3.bf16.xpose.msra.mxu1 %v472_v32  ;;  %v416_v35 = vpop.f32.mrb[4].mxu0 }
  0xe4   :  { %v188_v36 = vadd.f32 %v416_v35, %v351_v21  ;;  %474 = vmatprep.subr.bf16.mxu1 %v527_v19  ;;  %v182_v37 = vpop.f32.mrb[5].mxu0 }
  0xe5   :  { %v475_v38 = vpack.c.bf16 %v244_v33, %v243_v34  ;;  %v183_v39 = vadd.f32 %v351_v21, %v182_v37 }
  0xe6   :  { %v246_v40 = vmax.f32 %v188_v36, 0.0 }
  0xe7   :  { %v245_v41 = vmax.f32 %v183_v39, 0.0  ;;  %v419_v42 = vpop.f32.mrb[6].mxu0 }
  0xe8   :  { %v198_v43 = vadd.f32 %v419_v42, %v351_v21  ;;  %v192_v44 = vpop.f32.mrb[7].mxu0 }
  0xe9   :  { %v478_v45 = vpack.c.bf16 %v246_v40, %v245_v41  ;;  %v193_v46 = vadd.f32 %v351_v21, %v192_v44 }
  0xea   :  { %v248_v47 = vmax.f32 %v198_v43, 0.0 }
  0xeb   :  { %476 = vmatpush3.bf16.xpose.msra.mxu1 %v475_v38  ;;  %v247_v48 = vmax.f32 %v193_v46, 0.0  ;;  %v422_v49 = vpop.f32.mrb[8].mxu0 }
  0xec   :  { %477 = vmatprep.subr.bf16.mxu1 %v527_v19  ;;  %v208_v50 = vadd.f32 %v422_v49, %v351_v21  ;;  %v202_v51 = vpop.f32.mrb[9].mxu0 }
  0xed   :  { %v481_v52 = vpack.c.bf16 %v248_v47, %v247_v48  ;;  %v203_v53 = vadd.f32 %v351_v21, %v202_v51 }
  0xee   :  { %v250_v54 = vmax.f32 %v208_v50, 0.0 }
  0xef   :  { %v249_v55 = vmax.f32 %v203_v53, 0.0  ;;  %v425_v56 = vpop.f32.mrb[10].mxu0 }
  0xf0   :  { %v218_v57 = vadd.f32 %v425_v56, %v351_v21  ;;  %v212_v58 = vpop.f32.mrb[11].mxu0 }
  0xf1   :  { %v484_v59 = vpack.c.bf16 %v250_v54, %v249_v55  ;;  %v213_v60 = vadd.f32 %v351_v21, %v212_v58 }
  0xf2   :  { %v252_v61 = vmax.f32 %v218_v57, 0.0 }
  0xf3   :  { %479 = vmatpush3.bf16.xpose.msra.mxu1 %v478_v45  ;;  %v251_v62 = vmax.f32 %v213_v60, 0.0  ;;  %v428_v63 = vpop.f32.mrb[12].mxu0 }
  0xf4   :  { %480 = vmatprep.subr.bf16.mxu1 %v527_v19  ;;  %v228_v0 = vadd.f32 %v428_v63, %v351_v21  ;;  %v222_v1 = vpop.f32.mrb[13].mxu0 }
  0xf5   :  { %v487_v2 = vpack.c.bf16 %v252_v61, %v251_v62  ;;  %v223_v3 = vadd.f32 %v351_v21, %v222_v1 }
  0xf6   :  { %v254_v4 = vmax.f32 %v228_v0, 0.0 }
  0xf7   :  { %v253_v5 = vmax.f32 %v223_v3, 0.0  ;;  %v431_v6 = vpop.f32.mrb[14].mxu0 }
  0xf8   :  { %v238_v7 = vadd.f32 %v431_v6, %v351_v21  ;;  %v232_v8 = vpop.f32.mrb[15].mxu0 }
  0xf9   :  { %v490_v9 = vpack.c.bf16 %v254_v4, %v253_v5  ;;  %v233_v10 = vadd.f32 %v351_v21, %v232_v8 }
  0xfa   :  { %v256_v11 = vmax.f32 %v238_v7, 0.0 }
  0xfb   :  { %482 = vmatpush3.bf16.xpose.msra.mxu1 %v481_v52  ;;  %v255_v12 = vmax.f32 %v233_v10, 0.0 }
  0xfc   :  { %483 = vmatprep.subr.bf16.mxu1 %v527_v19 }
  0xfd   :  { %v493_v13 = vpack.c.bf16 %v256_v11, %v255_v12 }
 0x103   :  { %485 = vmatpush3.bf16.xpose.msra.mxu1 %v484_v59 }
 0x104   :  { %486 = vmatprep.subr.bf16.mxu1 %v527_v19 }
 0x10b   :  { %488 = vmatpush3.bf16.xpose.msra.mxu1 %v487_v2 }
 0x10c   :  { %489 = vmatprep.subr.bf16.mxu1 %v527_v19 }
 0x113   :  { %491 = vmatpush3.bf16.xpose.msra.mxu1 %v490_v9 }
 0x114   :  { %492 = vmatprep.subr.bf16.mxu1 %v527_v19 }
 0x11b   :  { %494 = vmatpush3.bf16.xpose.msra.mxu1 %v493_v13 }
 0x122   :  { %465 = vmatmul.mubr.f32.vlgmr.msra.gmra.mrb[0].mxu1 %v257_v14 }
 0x1f5   :  { %v326_v16 = vpop.f32.mrb[0].mxu1 }
 0x1f6   :  { %v327_v17 = vadd.f32 %v326_v16, %v259_v15  ;;  %v466_v18 = vpop.f32.mrb[1].mxu1 }
 0x1f8   :  { %v368_v20 = vmul.f32 -1.442695, %v327_v17 }
 0x1fa   :  { %499 = vpow2.f32 %v368_v20 }
 0x204   :  { %v500_v21 = vpop.eup %499 }
 0x205   :  { %v333_v22 = vadd.f32 1.0, %v500_v21 }
 0x207   :  { %501 = vrcp.f32 %v333_v22 }
 0x211   :  { %v502_v19 = vpop.eup %501 }
 0x212   :  { %336 = vst [vmem:[#allocation3] sm:$0x1] %v502_v19 }
 0x213   :  { %514 = shalt.err (!%p511_p4)
}
 0x214   :  { %s515_s10 = scalar_lea.hbm %s665_s5, 16 }
 0x215   :  { %p516_p5 = scmp.ne.s32.totalorder %s665_s5, %s515_s10  ;;  %p519_p6 = scmp.lt.u32.totalorder %s515_s10, %s665_s5 }
 0x217   :  { %p521_p7 = pnand %p519_p6, %p516_p5 }
 0x219   :  { %524 = shalt.err (!%p521_p7)
}
 0x21a   :  { %346 = dma.vmem_to_hbm [thread:$0]  %s344_s7, 16, %s665_s5, [#allocation4]  }
 0x21b   :  { %525 = dma.done.wait [#allocation4], 16  }
 0x21c   :  { %526 = vsyncadd [#allocation4], 4294967280 }
 0x21d   :  { %350 = vsyncpa [#allocation4], 1 }

</bundles_post_ra>
